<compile_context>
chip_gen: v5e
topology: v5e:2x2
jax: 0.10.0
libtpu: 0.0.40
codegen_flags: <defaults>
</compile_context>

<pallas_src>
import functools
import math

import jax
import jax.numpy as jnp
from jax.experimental import pallas as pl
from jax.experimental.pallas import tpu as pltpu

# def_gain table from bias_act.activation_funcs (subset supported here).
_ACT_DEF_GAIN = {"linear": 1.0, "relu": math.sqrt(2.0), "lrelu": math.sqrt(2.0)}
_LRELU_ALPHA = 0.2


def _round_up(x, m):
    return ((x + m - 1) // m) * m


def conv2d_row_kernel(x_ref, w_ref, b_ref, o_ref, *, K, Wout,
                      weight_gain, act, act_gain):
    """One grid step = one batch element, one output row.

    x_ref: [Hp, Wp, Cin]       zero-padded input image (VMEM-resident across rows)
    w_ref: [K*K, Cin, Cout_p]  pre-packed weights (tap-major, lane-padded Cout)
    b_ref: [1, Cout_p]
    o_ref: [Wout, Cout_p]      one lane-dense output row
    """
    oh = pl.program_id(1)
    cout_p = o_ref.shape[-1]
    acc = jnp.zeros((Wout, cout_p), jnp.float32)
    # Static K*K tap loop: each tap is a [Wout, Cin] x [Cin, Cout_p] MXU matmul
    # with f32 accumulation.
    for kh in range(K):
        for kw in range(K):
            x_row = x_ref[oh + kh, pl.ds(kw, Wout), :]       # [Wout, Cin]
            w_tap = w_ref[kh * K + kw]                       # [Cin, Cout_p]
            acc = acc + jnp.dot(x_row, w_tap,
                                preferred_element_type=jnp.float32)
    # Scale the small accumulator once (not the weight tile), then bias + act
    # + gain, all in f32.
    y = acc * jnp.float32(weight_gain) + b_ref[...].astype(jnp.float32)
    if act == "relu":
        y = jnp.maximum(y, 0.0)
    elif act == "lrelu":
        y = jnp.where(y >= 0.0, y, _LRELU_ALPHA * y)
    elif act != "linear":
        raise NotImplementedError(act)  # TODO(synk): other bias_act activations
    o_ref[...] = (y * jnp.float32(act_gain)).astype(o_ref.dtype)


def conv2d_bias_act(x_padded, w_packed, b_packed, *, K, Hout, Wout,
                    weight_gain, act, act_gain):
    """x_padded: [N, Hp, Wp, Cin]; w_packed: [K*K, Cin, Cout_p]; b_packed: [1, Cout_p]
    -> [N, Hout, Wout, Cout_p]."""
    N, Hp, Wp, Cin = x_padded.shape
    cout_p = w_packed.shape[-1]
    kernel = functools.partial(
        conv2d_row_kernel, K=K, Wout=Wout,
        weight_gain=float(weight_gain), act=act, act_gain=float(act_gain))
    out = pl.pallas_call(
        kernel,
        out_shape=jax.ShapeDtypeStruct((N * Hout, Wout, cout_p), x_padded.dtype),
        grid=(N, Hout),
        in_specs=[
            # Whole padded image per batch element; the block index does not change
            # along the row axis, so the image stays resident in VMEM.
            pl.BlockSpec((None, Hp, Wp, Cin), lambda n, oh: (n, 0, 0, 0)),
            pl.BlockSpec((K * K, Cin, cout_p), lambda n, oh: (0, 0, 0)),
            pl.BlockSpec((1, cout_p), lambda n, oh: (0, 0)),
        ],
        out_specs=pl.BlockSpec((None, Wout, cout_p),
                               lambda n, oh: (n * Hout + oh, 0, 0)),
        compiler_params=pltpu.CompilerParams(
            dimension_semantics=("parallel", "arbitrary")),
    )(x_padded, w_packed, b_packed)
    return out.reshape(N, Hout, Wout, cout_p)


class Conv2dLayerPallas:
    """JAX/Pallas port of Conv2dLayer (up=1, down=1 path)."""

    def __init__(self, in_channels, out_channels, kernel_size, bias=True,
                 activation="linear", up=1, down=1,
                 resample_filter=(1, 3, 3, 1), key=jax.random.PRNGKey(0)):
        if up != 1 or down != 1:
            # TODO(synk): upfirdn2d resample filter (up/down != 1) not implemented.
            raise NotImplementedError("only up=1, down=1 is supported")
        self.in_channels = in_channels
        self.out_channels = out_channels
        self.kernel_size = kernel_size
        self.activation = activation
        self.padding = kernel_size // 2
        self.weight_gain = 1.0 / math.sqrt(in_channels * kernel_size ** 2)
        self.act_gain = _ACT_DEF_GAIN[activation]
        f = jnp.asarray(resample_filter, jnp.float32)
        self.resample_filter = f / jnp.sum(f)  # unused for up=down=1

        # Parameters (torch.randn / torch.zeros equivalents).
        self.weight = jax.random.normal(
            key, (out_channels, in_channels, kernel_size, kernel_size), jnp.float32)
        self.bias = jnp.zeros((out_channels,), jnp.float32) if bias else None

        # Pre-pack weights ONCE at init (not per forward):
        #   [Cout, Cin, K, K] -> [K*K, Cin, Cout_p], Cout padded to a lane multiple.
        self.cout_p = _round_up(out_channels, 128)
        w = jnp.transpose(self.weight, (2, 3, 1, 0)).reshape(
            kernel_size * kernel_size, in_channels, out_channels)
        self.w_packed = jnp.pad(
            w, ((0, 0), (0, 0), (0, self.cout_p - out_channels)))
        b = self.bias if self.bias is not None else jnp.zeros((out_channels,),
                                                              jnp.float32)
        self.b_packed = jnp.pad(
            b, (0, self.cout_p - out_channels)).reshape(1, self.cout_p)

    def __call__(self, x, gain=1.0):
        # x: [N, Cin, H, W] (PyTorch layout) -> NHWC for the kernel (glue).
        N, Cin, H, W = x.shape
        assert Cin == self.in_channels
        K, p = self.kernel_size, self.padding
        Hout = H + 2 * p - K + 1
        Wout = W + 2 * p - K + 1
        xh = jnp.transpose(x, (0, 2, 3, 1))                           # NHWC (glue)
        xp = jnp.pad(xh, ((0, 0), (p, p), (p, p), (0, 0)))            # zero pad
        out = conv2d_bias_act(
            xp, self.w_packed, self.b_packed, K=K, Hout=Hout, Wout=Wout,
            weight_gain=self.weight_gain, act=self.activation,
            act_gain=self.act_gain * gain)
        out = out[..., : self.out_channels]                           # drop lane pad
        return jnp.transpose(out, (0, 3, 1, 2))                       # back to NCHW


def _reference_forward(layer, x, gain=1.0):
    """Pure-JAX reference matching the PyTorch Conv2dLayer semantics."""
    w = layer.weight * layer.weight_gain
    y = jax.lax.conv_general_dilated(
        x, w, window_strides=(1, 1),
        padding=[(layer.padding, layer.padding)] * 2,
        dimension_numbers=("NCHW", "OIHW", "NCHW"))
    if layer.bias is not None:
        y = y + layer.bias.reshape(1, -1, 1, 1)
    if layer.activation == "relu":
        y = jnp.maximum(y, 0.0)
    elif layer.activation == "lrelu":
        y = jnp.where(y >= 0.0, y, _LRELU_ALPHA * y)
    return y * (layer.act_gain * gain)


if __name__ == "__main__":
    key = jax.random.PRNGKey(0)
    k_w1, k_w2, k_x = jax.random.split(key, 3)

    N, Cin, H, W = 2, 4, 16, 16
    Cout, K = 8, 3

    x = jax.random.normal(k_x, (N, Cin, H, W), jnp.float32)

    # Default config (activation='linear').
    layer_lin = Conv2dLayerPallas(Cin, Cout, K, bias=True, activation="linear",
                                  key=k_w1)
    out_lin = jax.block_until_ready(layer_lin(x))
    ref_lin = _reference_forward(layer_lin, x)
    assert out_lin.shape == (N, Cout, H, W), out_lin.shape
    assert jnp.allclose(out_lin, ref_lin, atol=1e-4, rtol=1e-4), \
        float(jnp.max(jnp.abs(out_lin - ref_lin)))

    # StyleGAN-typical config (activation='lrelu', def_gain=sqrt(2)).
    layer_act = Conv2dLayerPallas(Cin, Cout, K, bias=True, activation="lrelu",
                                  key=k_w2)
    out_act = jax.block_until_ready(layer_act(x, gain=1.0))
    ref_act = _reference_forward(layer_act, x, gain=1.0)
    assert out_act.shape == (N, Cout, H, W), out_act.shape
    assert jnp.allclose(out_act, ref_act, atol=1e-4, rtol=1e-4), \
        float(jnp.max(jnp.abs(out_act - ref_act)))

    print("KERNEL_OK")
</pallas_src>

<mosaic_0001>
module attributes {stable_mosaic.version = 11 : i64} {
  func.func @conv2d_row_kernel(%arg0: i32, %arg1: i32, %arg2: memref<1x18x18x4xf32, #tpu.memory_space<vmem>>, %arg3: memref<9x4x128xf32, #tpu.memory_space<vmem>>, %arg4: memref<1x128xf32, #tpu.memory_space<vmem>>, %arg5: memref<1x16x128xf32, #tpu.memory_space<vmem>>) attributes {dimension_semantics = [#tpu.dimension_semantics<parallel>, #tpu.dimension_semantics<arbitrary>], iteration_bounds = array<i64: 2, 16>, scalar_prefetch = 0 : i64, scratch_operands = 0 : i64, tpu.core_type = #tpu.core_type<tc>, window_params = [{transform_indices = @transform_0, window_bounds = array<i64: 1, 18, 18, 4>}, {pipeline_mode = #tpu.pipeline_mode<synchronous>, transform_indices = @transform_1, window_bounds = array<i64: 9, 4, 128>}, {pipeline_mode = #tpu.pipeline_mode<synchronous>, transform_indices = @transform_2, window_bounds = array<i64: 1, 128>}, {transform_indices = @transform_3, window_bounds = array<i64: 1, 16, 128>}]} {
    %cst = arith.constant 0.000000e+00 : f32
    %0 = vector.broadcast %cst : f32 to vector<16x128xf32>
    %c0_i32 = arith.constant 0 : i32
    %1 = arith.addi %arg1, %c0_i32 : i32
    %c0 = arith.constant 0 : index
    %2 = arith.index_cast %1 : i32 to index
    %c0_0 = arith.constant 0 : index
    %c0_1 = arith.constant 0 : index
    %3 = vector.load %arg2[%c0, %2, %c0_0, %c0_1] : memref<1x18x18x4xf32, #tpu.memory_space<vmem>>, vector<1x1x16x4xf32>
    %4 = vector.shape_cast %3 : vector<1x1x16x4xf32> to vector<16x4xf32>
    %c0_2 = arith.constant 0 : index
    %c0_3 = arith.constant 0 : index
    %c0_4 = arith.constant 0 : index
    %5 = vector.load %arg3[%c0_2, %c0_3, %c0_4] : memref<9x4x128xf32, #tpu.memory_space<vmem>>, vector<1x4x128xf32>
    %6 = vector.shape_cast %5 : vector<1x4x128xf32> to vector<4x128xf32>
    %cst_5 = arith.constant dense<0.000000e+00> : vector<16x128xf32>
    %7 = tpu.matmul %4, %6, %cst_5 {dimension_numbers = #tpu.dot_dimension_numbers<[1], [0], [0], [1], [0, 0, 1, 1], [], []>} : vector<16x4xf32>, vector<4x128xf32>, vector<16x128xf32> -> vector<16x128xf32>
    %8 = arith.addf %0, %7 : vector<16x128xf32>
    %c0_i32_6 = arith.constant 0 : i32
    %9 = arith.addi %arg1, %c0_i32_6 : i32
    %c0_7 = arith.constant 0 : index
    %10 = arith.index_cast %9 : i32 to index
    %c1 = arith.constant 1 : index
    %c0_8 = arith.constant 0 : index
    %11 = vector.load %arg2[%c0_7, %10, %c1, %c0_8] : memref<1x18x18x4xf32, #tpu.memory_space<vmem>>, vector<1x1x16x4xf32>
    %12 = vector.shape_cast %11 : vector<1x1x16x4xf32> to vector<16x4xf32>
    %c1_9 = arith.constant 1 : index
    %c0_10 = arith.constant 0 : index
    %c0_11 = arith.constant 0 : index
    %13 = vector.load %arg3[%c1_9, %c0_10, %c0_11] : memref<9x4x128xf32, #tpu.memory_space<vmem>>, vector<1x4x128xf32>
    %14 = vector.shape_cast %13 : vector<1x4x128xf32> to vector<4x128xf32>
    %cst_12 = arith.constant dense<0.000000e+00> : vector<16x128xf32>
    %15 = tpu.matmul %12, %14, %cst_12 {dimension_numbers = #tpu.dot_dimension_numbers<[1], [0], [0], [1], [0, 0, 1, 1], [], []>} : vector<16x4xf32>, vector<4x128xf32>, vector<16x128xf32> -> vector<16x128xf32>
    %16 = arith.addf %8, %15 : vector<16x128xf32>
    %c0_i32_13 = arith.constant 0 : i32
    %17 = arith.addi %arg1, %c0_i32_13 : i32
    %c0_14 = arith.constant 0 : index
    %18 = arith.index_cast %17 : i32 to index
    %c2 = arith.constant 2 : index
    %c0_15 = arith.constant 0 : index
    %19 = vector.load %arg2[%c0_14, %18, %c2, %c0_15] : memref<1x18x18x4xf32, #tpu.memory_space<vmem>>, vector<1x1x16x4xf32>
    %20 = vector.shape_cast %19 : vector<1x1x16x4xf32> to vector<16x4xf32>
    %c2_16 = arith.constant 2 : index
    %c0_17 = arith.constant 0 : index
    %c0_18 = arith.constant 0 : index
    %21 = vector.load %arg3[%c2_16, %c0_17, %c0_18] : memref<9x4x128xf32, #tpu.memory_space<vmem>>, vector<1x4x128xf32>
    %22 = vector.shape_cast %21 : vector<1x4x128xf32> to vector<4x128xf32>
    %cst_19 = arith.constant dense<0.000000e+00> : vector<16x128xf32>
    %23 = tpu.matmul %20, %22, %cst_19 {dimension_numbers = #tpu.dot_dimension_numbers<[1], [0], [0], [1], [0, 0, 1, 1], [], []>} : vector<16x4xf32>, vector<4x128xf32>, vector<16x128xf32> -> vector<16x128xf32>
    %24 = arith.addf %16, %23 : vector<16x128xf32>
    %c1_i32 = arith.constant 1 : i32
    %25 = arith.addi %arg1, %c1_i32 : i32
    %c0_20 = arith.constant 0 : index
    %26 = arith.index_cast %25 : i32 to index
    %c0_21 = arith.constant 0 : index
    %c0_22 = arith.constant 0 : index
    %27 = vector.load %arg2[%c0_20, %26, %c0_21, %c0_22] : memref<1x18x18x4xf32, #tpu.memory_space<vmem>>, vector<1x1x16x4xf32>
    %28 = vector.shape_cast %27 : vector<1x1x16x4xf32> to vector<16x4xf32>
    %c3 = arith.constant 3 : index
    %c0_23 = arith.constant 0 : index
    %c0_24 = arith.constant 0 : index
    %29 = vector.load %arg3[%c3, %c0_23, %c0_24] : memref<9x4x128xf32, #tpu.memory_space<vmem>>, vector<1x4x128xf32>
    %30 = vector.shape_cast %29 : vector<1x4x128xf32> to vector<4x128xf32>
    %cst_25 = arith.constant dense<0.000000e+00> : vector<16x128xf32>
    %31 = tpu.matmul %28, %30, %cst_25 {dimension_numbers = #tpu.dot_dimension_numbers<[1], [0], [0], [1], [0, 0, 1, 1], [], []>} : vector<16x4xf32>, vector<4x128xf32>, vector<16x128xf32> -> vector<16x128xf32>
    %32 = arith.addf %24, %31 : vector<16x128xf32>
    %c1_i32_26 = arith.constant 1 : i32
    %33 = arith.addi %arg1, %c1_i32_26 : i32
    %c0_27 = arith.constant 0 : index
    %34 = arith.index_cast %33 : i32 to index
    %c1_28 = arith.constant 1 : index
    %c0_29 = arith.constant 0 : index
    %35 = vector.load %arg2[%c0_27, %34, %c1_28, %c0_29] : memref<1x18x18x4xf32, #tpu.memory_space<vmem>>, vector<1x1x16x4xf32>
    %36 = vector.shape_cast %35 : vector<1x1x16x4xf32> to vector<16x4xf32>
    %c4 = arith.constant 4 : index
    %c0_30 = arith.constant 0 : index
    %c0_31 = arith.constant 0 : index
    %37 = vector.load %arg3[%c4, %c0_30, %c0_31] : memref<9x4x128xf32, #tpu.memory_space<vmem>>, vector<1x4x128xf32>
    %38 = vector.shape_cast %37 : vector<1x4x128xf32> to vector<4x128xf32>
    %cst_32 = arith.constant dense<0.000000e+00> : vector<16x128xf32>
    %39 = tpu.matmul %36, %38, %cst_32 {dimension_numbers = #tpu.dot_dimension_numbers<[1], [0], [0], [1], [0, 0, 1, 1], [], []>} : vector<16x4xf32>, vector<4x128xf32>, vector<16x128xf32> -> vector<16x128xf32>
    %40 = arith.addf %32, %39 : vector<16x128xf32>
    %c1_i32_33 = arith.constant 1 : i32
    %41 = arith.addi %arg1, %c1_i32_33 : i32
    %c0_34 = arith.constant 0 : index
    %42 = arith.index_cast %41 : i32 to index
    %c2_35 = arith.constant 2 : index
    %c0_36 = arith.constant 0 : index
    %43 = vector.load %arg2[%c0_34, %42, %c2_35, %c0_36] : memref<1x18x18x4xf32, #tpu.memory_space<vmem>>, vector<1x1x16x4xf32>
    %44 = vector.shape_cast %43 : vector<1x1x16x4xf32> to vector<16x4xf32>
    %c5 = arith.constant 5 : index
    %c0_37 = arith.constant 0 : index
    %c0_38 = arith.constant 0 : index
    %45 = vector.load %arg3[%c5, %c0_37, %c0_38] : memref<9x4x128xf32, #tpu.memory_space<vmem>>, vector<1x4x128xf32>
    %46 = vector.shape_cast %45 : vector<1x4x128xf32> to vector<4x128xf32>
    %cst_39 = arith.constant dense<0.000000e+00> : vector<16x128xf32>
    %47 = tpu.matmul %44, %46, %cst_39 {dimension_numbers = #tpu.dot_dimension_numbers<[1], [0], [0], [1], [0, 0, 1, 1], [], []>} : vector<16x4xf32>, vector<4x128xf32>, vector<16x128xf32> -> vector<16x128xf32>
    %48 = arith.addf %40, %47 : vector<16x128xf32>
    %c2_i32 = arith.constant 2 : i32
    %49 = arith.addi %arg1, %c2_i32 : i32
    %c0_40 = arith.constant 0 : index
    %50 = arith.index_cast %49 : i32 to index
    %c0_41 = arith.constant 0 : index
    %c0_42 = arith.constant 0 : index
    %51 = vector.load %arg2[%c0_40, %50, %c0_41, %c0_42] : memref<1x18x18x4xf32, #tpu.memory_space<vmem>>, vector<1x1x16x4xf32>
    %52 = vector.shape_cast %51 : vector<1x1x16x4xf32> to vector<16x4xf32>
    %c6 = arith.constant 6 : index
    %c0_43 = arith.constant 0 : index
    %c0_44 = arith.constant 0 : index
    %53 = vector.load %arg3[%c6, %c0_43, %c0_44] : memref<9x4x128xf32, #tpu.memory_space<vmem>>, vector<1x4x128xf32>
    %54 = vector.shape_cast %53 : vector<1x4x128xf32> to vector<4x128xf32>
    %cst_45 = arith.constant dense<0.000000e+00> : vector<16x128xf32>
    %55 = tpu.matmul %52, %54, %cst_45 {dimension_numbers = #tpu.dot_dimension_numbers<[1], [0], [0], [1], [0, 0, 1, 1], [], []>} : vector<16x4xf32>, vector<4x128xf32>, vector<16x128xf32> -> vector<16x128xf32>
    %56 = arith.addf %48, %55 : vector<16x128xf32>
    %c2_i32_46 = arith.constant 2 : i32
    %57 = arith.addi %arg1, %c2_i32_46 : i32
    %c0_47 = arith.constant 0 : index
    %58 = arith.index_cast %57 : i32 to index
    %c1_48 = arith.constant 1 : index
    %c0_49 = arith.constant 0 : index
    %59 = vector.load %arg2[%c0_47, %58, %c1_48, %c0_49] : memref<1x18x18x4xf32, #tpu.memory_space<vmem>>, vector<1x1x16x4xf32>
    %60 = vector.shape_cast %59 : vector<1x1x16x4xf32> to vector<16x4xf32>
    %c7 = arith.constant 7 : index
    %c0_50 = arith.constant 0 : index
    %c0_51 = arith.constant 0 : index
    %61 = vector.load %arg3[%c7, %c0_50, %c0_51] : memref<9x4x128xf32, #tpu.memory_space<vmem>>, vector<1x4x128xf32>
    %62 = vector.shape_cast %61 : vector<1x4x128xf32> to vector<4x128xf32>
    %cst_52 = arith.constant dense<0.000000e+00> : vector<16x128xf32>
    %63 = tpu.matmul %60, %62, %cst_52 {dimension_numbers = #tpu.dot_dimension_numbers<[1], [0], [0], [1], [0, 0, 1, 1], [], []>} : vector<16x4xf32>, vector<4x128xf32>, vector<16x128xf32> -> vector<16x128xf32>
    %64 = arith.addf %56, %63 : vector<16x128xf32>
    %c2_i32_53 = arith.constant 2 : i32
    %65 = arith.addi %arg1, %c2_i32_53 : i32
    %c0_54 = arith.constant 0 : index
    %66 = arith.index_cast %65 : i32 to index
    %c2_55 = arith.constant 2 : index
    %c0_56 = arith.constant 0 : index
    %67 = vector.load %arg2[%c0_54, %66, %c2_55, %c0_56] : memref<1x18x18x4xf32, #tpu.memory_space<vmem>>, vector<1x1x16x4xf32>
    %68 = vector.shape_cast %67 : vector<1x1x16x4xf32> to vector<16x4xf32>
    %c8 = arith.constant 8 : index
    %c0_57 = arith.constant 0 : index
    %c0_58 = arith.constant 0 : index
    %69 = vector.load %arg3[%c8, %c0_57, %c0_58] : memref<9x4x128xf32, #tpu.memory_space<vmem>>, vector<1x4x128xf32>
    %70 = vector.shape_cast %69 : vector<1x4x128xf32> to vector<4x128xf32>
    %cst_59 = arith.constant dense<0.000000e+00> : vector<16x128xf32>
    %71 = tpu.matmul %68, %70, %cst_59 {dimension_numbers = #tpu.dot_dimension_numbers<[1], [0], [0], [1], [0, 0, 1, 1], [], []>} : vector<16x4xf32>, vector<4x128xf32>, vector<16x128xf32> -> vector<16x128xf32>
    %72 = arith.addf %64, %71 : vector<16x128xf32>
    %cst_60 = arith.constant 0.166666672 : f32
    %73 = vector.broadcast %cst_60 : f32 to vector<16x128xf32>
    %74 = arith.mulf %72, %73 : vector<16x128xf32>
    %c0_61 = arith.constant 0 : index
    %c0_62 = arith.constant 0 : index
    %75 = vector.load %arg4[%c0_61, %c0_62] : memref<1x128xf32, #tpu.memory_space<vmem>>, vector<1x128xf32>
    %76 = vector.broadcast %75 : vector<1x128xf32> to vector<16x128xf32>
    %77 = arith.addf %74, %76 : vector<16x128xf32>
    %cst_63 = arith.constant 1.000000e+00 : f32
    %78 = vector.broadcast %cst_63 : f32 to vector<16x128xf32>
    %79 = arith.mulf %77, %78 : vector<16x128xf32>
    %c0_64 = arith.constant 0 : index
    %c0_65 = arith.constant 0 : index
    %c0_66 = arith.constant 0 : index
    %80 = vector.load %arg5[%c0_64, %c0_65, %c0_66] : memref<1x16x128xf32, #tpu.memory_space<vmem>>, vector<1x16x128xf32>
    %81 = vector.shape_cast %80 : vector<1x16x128xf32> to vector<16x128xf32>
    %82 = vector.shape_cast %79 : vector<16x128xf32> to vector<1x16x128xf32>
    tpu.vector_store %arg5[%c0_64, %c0_65, %c0_66], %82 {strides = array<i32>} : memref<1x16x128xf32, #tpu.memory_space<vmem>>, vector<1x16x128xf32>,
    return
  }
  func.func @transform_0(%arg0: i32, %arg1: i32) -> (i32, i32, i32, i32) {
    %c0_i32 = arith.constant 0 : i32
    %c0_i32_0 = arith.constant 0 : i32
    %c0_i32_1 = arith.constant 0 : i32
    %c0_i32_2 = arith.constant 0 : i32
    return %arg0, %c0_i32, %c0_i32_0, %c0_i32_1 : i32, i32, i32, i32
  }
  func.func @transform_1(%arg0: i32, %arg1: i32) -> (i32, i32, i32) {
    %c0_i32 = arith.constant 0 : i32
    %c0_i32_0 = arith.constant 0 : i32
    %c0_i32_1 = arith.constant 0 : i32
    %c0_i32_2 = arith.constant 0 : i32
    return %c0_i32, %c0_i32_0, %c0_i32_1 : i32, i32, i32
  }
  func.func @transform_2(%arg0: i32, %arg1: i32) -> (i32, i32) {
    %c0_i32 = arith.constant 0 : i32
    %c0_i32_0 = arith.constant 0 : i32
    %c0_i32_1 = arith.constant 0 : i32
    return %c0_i32, %c0_i32_0 : i32, i32
  }
  func.func @transform_3(%arg0: i32, %arg1: i32) -> (i32, i32, i32) {
    %c16_i32 = arith.constant 16 : i32
    %0 = arith.muli %arg0, %c16_i32 : i32
    %1 = arith.addi %0, %arg1 : i32
    %c0_i32 = arith.constant 0 : i32
    %c0_i32_0 = arith.constant 0 : i32
    %c0_i32_1 = arith.constant 0 : i32
    return %1, %c0_i32, %c0_i32_0 : i32, i32, i32
  }
}

</mosaic_0001>

<bundles_post_ra>
// kernel: tpu_custom_call.1
= control target key start
LH: loop header
LB: loop body
LE: loop exit
PB: predicated region body
PF: predicated region fallthrough
CT: control target
= control target key end

     0   :  { %8 = vsyncpa [#allocation3], 0  ;;  %s1101_s0 = inlined_call_operand.vmem [shape: f32[2,18,18,4], index: 0, kind: input, shape index: {}]   ;;  %s1102_s1 = inlined_call_operand.vmem [shape: f32[9,4,128], index: 1, kind: input, shape index: {}]   ;;  %s1103_s2 = inlined_call_operand.vmem [shape: f32[1,128], index: 2, kind: input, shape index: {}]   ;;  %s1104_s3 = inlined_call_operand.hbm [shape: f32[32,16,128], index: 3, kind: output, shape index: {}]  }
   0x1   :  { %10 = vsyncpa [#allocation3 + $0x1], 0  ;;  %s902_s12 = smov 0   ;;  %s904_s13 = smov 0  }
   0x2   :  { %s906_s14 = smov 0   ;;  %s908_s15 = smov 0  }
   0x3   :  { %s910_s16 = smov 0   ;;  %s912_s17 = smov 0  }
   0x4   :  { %s914_s18 = smov 0   ;;  %s916_s19 = smov 0  }
   0x5 LB: > { %s645_s20 = sadd.s32 4294967295, %s878_s19   ;;  %s25_s21 = sadd.s32 1, %s870_s17  ;;  %s878_s19 = sphi %s916_s19, %s16_s19   ;;  %s874_s18 = sphi %s914_s18, %s1113_s18   ;;  %s870_s17 = sphi %s912_s17, %s1112_s17   ;;  %s866_s16 = sphi %s910_s16, %s1111_s16   ;;  %s862_s15 = sphi %s908_s15, %s1110_s15   ;;  %s858_s14 = sphi %s906_s14, %s1109_s14   ;;  %s854_s13 = sphi %s904_s13, %s1108_s13   ;;  %s850_s12 = sphi %s902_s12, %s1107_s12  }
   0x6   : > { %s28_s22 = sadd.s32 1, %s874_s18  ;;  %p26_p0 = scmp.ge.s32.totalorder %s25_s21, 16 }
   0x7   : > { %s647_s23 = sshll.u32 %s874_s18, 4  ;;  %s646_s24 = sadd.s32 4294967294, %s878_s19  }
   0x8   : > { %s101_s25 = sadd.s32 %s870_s17, %s647_s23  ;;  %s1115_s21 = smov (%p26_p0, %s25_s21), 0 }
   0x9   : > { %s1117_s22 = smov (!%p26_p0, %s28_s22), %s874_s18  ;;  %p117_p1 = scmp.ne.s32.totalorder %s858_s14, %s854_s13 }
   0xa   : > { %p118_p2 = scmp.eq.s32.totalorder %s645_s20, 31  ;;  %p30_p3 = scmp.ge.s32.totalorder %s1117_s22, 2 }
   0xb   : > { %p123_p4 = scmp.ne.s32.totalorder %s854_s13, %s850_s12  ;;  %p124_p6 = scmp.eq.s32.totalorder %s646_s24, 31 }
   0xc   : > { %p955_p5 = por %p118_p2, %p117_p1  ;;  %s1119_s22 = smov (%p30_p3, %s1117_s22), 0 }
   0xd   : > { %p961_p7 = por %p124_p6, %p123_p4  ;;  %p651_p8 = scmp.ge.s32.totalorder %s878_s19, 1 }
   0xe   : > { %s648_s28 = sshll.u32 %s1119_s22, 4  ;;  %p156_p9 = scmp.lt.s32.totalorder %s878_s19, 33 }
   0xf   : > { %s103_s29 = sadd.s32 %s648_s28, %s1115_s21  ;;  %s107_s30 = sadd.s32 1, %s858_s14 }
  0x10   : > { %s104_s4 = ssub.s32 %s101_s25, %s103_s29  ;;  %p157_p10 = pnand %p651_p8, %p156_p9 }
  0x11   : > { %p105_p11 = scmp.eq.s32.totalorder %s104_s4, 0  ;;  %p180_p12 = scmp.lt.s32.totalorder (!%p157_p10), %s866_s16, 1 }
  0x12   : > { %160 = sbr.rel (%p157_p10) target bundleno = 204 (0xcc), region = 32  ;;  %s702_s29 = sshll.u32 (!%p157_p10), %s866_s16, 4 }
  0x13   : > { %s971_s5 = scalar_select %p105_p11, %s858_s14, %s107_s30  }
  0x14   : > { %s187_s4 = smul.u32 (!%p157_p10), 24, %s862_s15  ;;  %s177_s30 = sand.u32 (!%p157_p10), 1, %s854_s13  }
  0x15   : > { %s652_s6 = sshll.u32 (!%p157_p10), %s177_s30, 4  ;;  %s545_s25 = scalar_lea.sflag (!%p157_p10), [#allocation3], %s177_s30 }
  0x17   : > { %v654_v0 = vld [vmem:[%s1102_s1 + $0x4] sm:$0xf]  ;;  %vm203_vm0 = vcmask 1043456   ;;  %v191_v1 = vld [vmem:[%s1102_s1] sm:$0xf]  ;;  %s181_s24 = scalar_select %p180_p12, %s866_s16, 1 }
  0x18   : > { %708 = vmatpush.msk.msra.mxu1 %vm203_vm0, %v654_v0  ;;  %v661_v2 = vld [vmem:[%s1102_s1 + $0x8] sm:$0xf]  ;;  %v685_v3 = vld [vmem:[%s1102_s1 + $0x18] sm:$0xf]  ;;  %655 = vmatpush.msk.msra.mxu0 %vm203_vm0, %v654_v0  ;;  %v667_v4 = vld [vmem:[%s1102_s1 + $0xc] sm:$0xf] }
  0x19   : > { %662 = vmatpush.msk.msra.mxu2 %vm203_vm0, %v661_v2  ;;  %v673_v5 = vld [vmem:[%s1102_s1 + $0x10] sm:$0xf]  ;;  %668 = vmatpush.msk.msra.mxu3 %vm203_vm0, %v667_v4  ;;  %v691_v6 = vld [vmem:[%s1102_s1 + $0x1c] sm:$0xf]  ;;  %s709_s8 = smul.u32 432, %s181_s24  ;;  %vm196_vm1 = vcmask 31744  }
  0x1a   : > { %658 = vmatpush.msk.msrb.mxu1 %vm203_vm0, %v191_v1  ;;  %674 = vmatpush.msk.msrb.mxu0 %vm203_vm0, %v673_v5  ;;  %v679_v7 = vld [vmem:[%s1102_s1 + $0x14] sm:$0xf]  ;;  %v697_v8 = vld [vmem:[%s1102_s1 + $0x20] sm:$0xf] }
  0x1b   : > { %686 = vmatpush.msk.msrb.mxu2 %vm203_vm0, %v685_v3  ;;  %692 = vmatpush.msk.msrb.mxu3 %vm203_vm0, %v691_v6  ;;  %s184_s11 = scalar_lea.vmem %s1101_s0, %s709_s8  ;;  %v783_v53 = vld [vmem:[%s1103_s2] ss:$0 sm:$0xff] }
  0x1c   : > { %s1008_s20 = scalar_lea.vmem %s184_s11, %s187_s4  ;;  %s553_s4 = sadd.s32 %s862_s15, %s702_s29 }
  0x1d   : > { %v193_v9 = vld [vmem:[%s1008_s20 + $0x9] sm:$0xff]  ;;  %v192_v11 = vld [vmem:[%s1008_s20 + $0x1] sm:$0xff]  ;;  %v665_v12 = vld [vmem:[%s1008_s20 + $0x18] sm:$0xff]  ;;  %s707_s9 = sshll.u32 %s553_s4, 4  ;;  %s179_s11 = scalar_lea.vmem [#allocation2], %s652_s6 }
  0x1e   : > { %v262_v10 = vld [vmem:[%s1008_s20 + $0x2] sm:$0xff]  ;;  %657 = vmatmul.msk.f32.vlgmr.msra.gmra.mxu1 %vm196_vm1, %v193_v9  ;;  %656 = vmatmul.msk.f32.vlgmr.msra.gmra.mxu0 %vm196_vm1, %v192_v11  ;;  %v263_v14 = vld [vmem:[%s1008_s20 + $0xa] sm:$0xff]  ;;  %v671_v16 = vld [vmem:[%s1008_s20 + $0x19] sm:$0xff]  ;;  %s558_s15 = scalar_lea.hbm %s1104_s3, %s707_s9  ;;  %s804_s6 = scalar_lea.hbm %s1104_s3, 512 }
  0x1f   : > { %663 = vmatmul.msk.f32.vlgmr.msra.gmra.mxu2 %vm196_vm1, %v262_v10  ;;  %669 = vmatmul.msk.f32.vlgmr.msra.gmra.mxu3 %vm196_vm1, %v665_v12  ;;  %v189_v13 = vld [vmem:[%s1008_s20] sm:$0xff]  ;;  %v190_v17 = vld [vmem:[%s1008_s20 + $0x8] sm:$0xff]  ;;  %v683_v18 = vld [vmem:[%s1008_s20 + $0x30] sm:$0xff]  ;;  %s561_s23 = sshll.u32 %s558_s15, 4  ;;  %s562_s23 = int_to_ptr.hbm [resolvable:$true] %s561_s23 }
  0x20   : > { %680 = vmatpush.msk.msra.mxu1 %vm203_vm0, %v679_v7  ;;  %698 = vmatpush.msk.msra.mxu0 %vm203_vm0, %v697_v8  ;;  %v666_v15 = vld [vmem:[%s1008_s20 + $0x20] sm:$0xff]  ;;  %v689_v20 = vld [vmem:[%s1008_s20 + $0x31] sm:$0xff]  ;;  %s798_s24 = sshra.s32 %s562_s23, 4  ;;  %s799_s24 = int_to_ptr.hbm [resolvable:$true] %s798_s24 }
  0x21   : > { %v672_v19 = vld [vmem:[%s1008_s20 + $0x21] sm:$0xff]  ;;  %v684_v22 = vld [vmem:[%s1008_s20 + $0x38] sm:$0xff]  ;;  %s800_s28 = scalar_lea.hbm %s799_s24, 16  ;;  %p805_p2 = scmp.lt.s32.totalorder %s799_s24, %s1104_s3 }
  0x22   : > { %v677_v21 = vld [vmem:[%s1008_s20 + $0x1a] sm:$0xff]  ;;  %v695_v24 = vld [vmem:[%s1008_s20 + $0x32] sm:$0xff]  ;;  %v678_v25 = vld [vmem:[%s1008_s20 + $0x22] sm:$0xff]  ;;  %p801_p13 = scmp.ne.s32.totalorder %s799_s24, %s800_s28  ;;  %p806_p3 = scmp.lt.s32.totalorder %s804_s6, %s800_s28 }
  0x23   : > { %v690_v23 = vld [vmem:[%s1008_s20 + $0x39] sm:$0xff] }
  0x24   : > { %v696_v26 = vld [vmem:[%s1008_s20 + $0x3a] sm:$0xff]  ;;  %s559_s20 = sshll.u32 %s179_s11, 4  ;;  %p802_p0 = pnand %p801_p13, %p955_p5  ;;  %s560_s20 = int_to_ptr.vmem [resolvable:$true] %s559_s20 }
  0x25   : > { %p807_p4 = por %p806_p3, %p805_p2 }
  0x26   : > { %659 = vmatmul.msk.f32.vlgmr.msrb.gmra.mxu1 %vm196_vm1, %v189_v13  ;;  %675 = vmatmul.msk.f32.vlgmr.msrb.gmra.mxu0 %vm196_vm1, %v671_v16  ;;  %p803_p1 = pneg %p802_p0 }
  0x27   : > { %664 = vmatmul.msk.f32.gmra.mxu2 %vm196_vm1, %v263_v14  ;;  %670 = vmatmul.msk.f32.gmra.mxu3 %vm196_vm1, %v666_v15 }
  0x28   : > { %p808_p6 = pnand %p807_p4, %p803_p1 }
  0x2e   : > { %660 = vmatmul.msk.f32.gmra.mxu1 %vm196_vm1, %v190_v17  ;;  %676 = vmatmul.msk.f32.gmra.mxu0 %vm196_vm1, %v672_v19 }
  0x2f   : > { %687 = vmatmul.msk.f32.vlgmr.msrb.gmra.mxu2 %vm196_vm1, %v683_v18  ;;  %693 = vmatmul.msk.f32.vlgmr.msrb.gmra.mxu3 %vm196_vm1, %v689_v20 }
  0x36   : > { %681 = vmatmul.msk.f32.vlgmr.msra.gmra.mxu1 %vm196_vm1, %v677_v21  ;;  %699 = vmatmul.msk.f32.vlgmr.msra.gmra.mxu0 %vm196_vm1, %v695_v24 }
  0x37   : > { %688 = vmatmul.msk.f32.gmra.mxu2 %vm196_vm1, %v684_v22  ;;  %694 = vmatmul.msk.f32.gmra.mxu3 %vm196_vm1, %v690_v23 }
  0x3e   : > { %682 = vmatmul.msk.f32.gmra.mxu1 %vm196_vm1, %v678_v25  ;;  %700 = vmatmul.msk.f32.gmra.mxu0 %vm196_vm1, %v696_v26 }
  0x9b   : > { %v227_v27 = vpop.f32.mrf.mxu1  ;;  %v224_v28 = vpop.f32.mrf.mxu0 }
  0xa2   : > { %v292_v29 = vpop.f32.mrf.mxu2  ;;  %v333_v30 = vpop.f32.mrf.mxu3 }
  0xa3   : > { %v256_v31 = vpop.f32.mrf.mxu1  ;;  %v371_v32 = vpop.f32.mrf.mxu0 }
  0xa4   : > { %v257_v33 = vadd.f32 %v256_v31, %v224_v28 }
  0xa6   : > { %v298_v35 = vadd.f32 %v292_v29, %v257_v33 }
  0xa8   : > { %v339_v39 = vadd.f32 %v333_v30, %v298_v35 }
  0xaa   : > { %v295_v34 = vpop.f32.mrf.mxu2  ;;  %v336_v36 = vpop.f32.mrf.mxu3  ;;  %v377_v42 = vadd.f32 %v371_v32, %v339_v39 }
  0xab   : > { %v259_v37 = vpop.f32.mrf.mxu1  ;;  %v374_v38 = vpop.f32.mrf.mxu0 }
  0xac   : > { %v260_v40 = vadd.f32 %v259_v37, %v227_v27 }
  0xae   : > { %v299_v43 = vadd.f32 %v295_v34, %v260_v40 }
  0xb0   : > { %v340_v48 = vadd.f32 %v336_v36, %v299_v43 }
  0xb2   : > { %v450_v41 = vpop.f32.mrf.mxu2  ;;  %v488_v45 = vpop.f32.mrf.mxu3  ;;  %v378_v51 = vadd.f32 %v374_v38, %v340_v48 }
  0xb3   : > { %v409_v44 = vpop.f32.mrf.mxu1  ;;  %v526_v47 = vpop.f32.mrf.mxu0 }
  0xb4   : > { %v415_v46 = vadd.f32 %v409_v44, %v377_v42 }
  0xb6   : > { %v456_v49 = vadd.f32 %v450_v41, %v415_v46 }
  0xb8   : > { %v494_v50 = vadd.f32 %v488_v45, %v456_v49 }
  0xba   : > { %v532_v52 = vadd.f32 %v526_v47, %v494_v50  ;;  %v453_v55 = vpop.f32.mrf.mxu2  ;;  %v491_v58 = vpop.f32.mrf.mxu3 }
  0xbb   : > { %v412_v54 = vpop.f32.mrf.mxu1  ;;  %v529_v61 = vpop.f32.mrf.mxu0 }
  0xbc   : > { %v534_v56 = vmul.f32 0.16666667, %v532_v52  ;;  %v416_v57 = vadd.f32 %v412_v54, %v378_v51 }
  0xbe   : > { %v540_v59 = vadd.f32 %v783_v53, %v534_v56  ;;  %v457_v60 = vadd.f32 %v453_v55, %v416_v57 }
  0xc0   : > { %542 = vst [vmem:[%s179_s11] sm:$0xff] %v540_v59  ;;  %v495_v62 = vadd.f32 %v491_v58, %v457_v60 }
  0xc2   : > { %v533_v63 = vadd.f32 %v529_v61, %v495_v62 }
  0xc4   : > { %v535_v0 = vmul.f32 0.16666667, %v533_v63 }
  0xc6   : > { %v541_v1 = vadd.f32 %v783_v53, %v535_v0 }
  0xc8   : > { %543 = vst [vmem:[%s179_s11 + $0x8] sm:$0xff] %v541_v1 }
  0xc9   : > { %811 = shalt.err (!%p808_p6)
}
  0xca   : > { %s880_s30 = smov 128   ;;  %s881_s9 = smov 8  }
  0xcb   : > { %710 = dma.vmem_to_hbm [thread:$0]  (%p955_p5), %s560_s20, 256, %s562_s23, %s545_s25, %s880_s30, %s880_s30, %s881_s9  }
  0xcc PF: > { %p716_p8 = scmp.ge.s32.totalorder %s878_s19, 2  ;;  %s576_s16 = sand.u32 1, %s850_s12  }
  0xcd   : > { %s577_s10 = scalar_lea.sflag [#allocation3], %s576_s16 }
  0xce   : > { %p713_p9 = pnand %p716_p8, %p961_p7 }
  0xd0   : > { %p714_p10 = pneg %p713_p9 }
  0xd2   : > { %845 = dma.done.wait (%p714_p10), %s577_s10, 256  }
  0xd3   : > { %847 = vsyncadd (%p714_p10), %s577_s10, 4294967040  ;;  %s16_s19 = sadd.s32 1, %s878_s19   ;;  %s1107_s12 = smov %s854_s13 }
  0xd4   : > { %p13_p11 = scmp.ge.s32.totalorder %s16_s19, 34   ;;  %s1108_s13 = smov %s858_s14 }
  0xd5   : > { %s1109_s14 = smov %s971_s5  ;;  %s1110_s15 = smov %s870_s17 }
  0xd6   : > { %s1111_s16 = smov %s874_s18  ;;  %s1112_s17 = smov %s1115_s21 }
  0xd7   : > { %s1113_s18 = smov %s1119_s22  ;;  %15 = sbr.rel (!%p13_p11) target bundleno = 5 (0x5), region = 78 }
  0xdc   :  { %583 = vsyncpa [#allocation3], 1 }
  0xdd   :  { %585 = vsyncpa [#allocation3 + $0x1], 1 }

</bundles_post_ra>
